<compile_context>
chip_gen: v6e
topology: v6e:2x2x1
jax: 0.10.0
libtpu: 0.0.40
codegen_flags: <defaults>
</compile_context>

<pallas_src>
import functools

import jax
import jax.numpy as jnp
from jax import lax
from jax.experimental import pallas as pl
from jax.experimental.pallas import tpu as pltpu


# --------------------------------------------------------------------------- #
# Kernels
# --------------------------------------------------------------------------- #
def _softmax_neg(gram):
    """softmax(rowmax(gram) - gram) == softmax(-gram).

    The numerically stable shift of -gram is +rowmin(gram), so a single row
    reduction suffices. Exact divide (no approx reciprocal): it runs once per
    block, off the hot accumulation loop.
    """
    row_min = jnp.min(gram, axis=-1, keepdims=True)
    e = jnp.exp(row_min - gram)
    return e / jnp.sum(e, axis=-1, keepdims=True)


def _fused_kernel(beta_ref, x_ref, o_ref, *, mxu_dtype=None):
    """Single-pass gram -> softmax -> projection for one batch tile.

    beta_ref: (1,) scalar in SMEM
    x_ref   : (Bt, C, HWp)
    o_ref   : (Bt, C, HWp)
    """
    x = x_ref[...]
    x_mm = x.astype(mxu_dtype) if mxu_dtype is not None else x

    # gram[b] = x[b] @ x[b]^T, contracting both operands on the HW axis
    # (no materialized transpose), batched over Bt.
    gram = lax.dot_general(
        x_mm, x_mm,
        dimension_numbers=(((2,), (2,)), ((0,), (0,))),
        preferred_element_type=jnp.float32,
    )
    att = _softmax_neg(gram)
    att_mm = att.astype(mxu_dtype) if mxu_dtype is not None else att

    feat = lax.dot_general(
        att_mm, x_mm,
        dimension_numbers=(((2,), (1,)), ((0,), (0,))),
        preferred_element_type=jnp.float32,
    )
    beta = beta_ref[0]
    o_ref[...] = (beta * feat + x.astype(jnp.float32)).astype(o_ref.dtype)


def _attention_kernel(x_ref, att_ref, *, mxu_dtype=None):
    """Two-pass path, pass 1: accumulate gram over HW tiles; softmax at the last tile.

    x_ref  : (Bt, C, T)   one HW tile for Bt batch elements
    att_ref: (Bt, C, C)   resident output block (same block for every HW tile)
    """
    t = pl.program_id(1)
    x = x_ref[...]
    if mxu_dtype is not None:
        x = x.astype(mxu_dtype)
    partial = lax.dot_general(
        x, x,
        dimension_numbers=(((2,), (2,)), ((0,), (0,))),
        preferred_element_type=jnp.float32,
    )

    @pl.when(t == 0)
    def _():
        att_ref[...] = partial

    @pl.when(t > 0)
    def _():
        att_ref[...] += partial

    @pl.when(t == pl.num_programs(1) - 1)
    def _():
        att_ref[...] = _softmax_neg(att_ref[...])


def _project_kernel(beta_ref, att_ref, x_ref, o_ref, *, mxu_dtype=None):
    """Two-pass path, pass 2: out_tile = beta * (att @ x_tile) + x_tile."""
    beta = beta_ref[0]
    att = att_ref[...]
    x = x_ref[...]
    att_mm = att.astype(mxu_dtype) if mxu_dtype is not None else att
    x_mm = x.astype(mxu_dtype) if mxu_dtype is not None else x
    feat = lax.dot_general(
        att_mm, x_mm,
        dimension_numbers=(((2,), (1,)), ((0,), (0,))),
        preferred_element_type=jnp.float32,
    )
    o_ref[...] = (beta * feat + x.astype(jnp.float32)).astype(o_ref.dtype)


# --------------------------------------------------------------------------- #
# Generation-aware sizing heuristics
# --------------------------------------------------------------------------- #
def _physical_vmem_bytes():
    """VMEM capacity per TensorCore (128 MiB v5e/v6e, 64 MiB v7x)."""
    try:
        cap = int(pltpu.get_tpu_info().vmem_capacity_bytes)
        if cap > 0:
            return cap
    except Exception:
        pass
    return 64 << 20  # conservative fallback (v7x per-TensorCore VMEM)


def _resolve_mxu_dtype(mxu_dtype, c):
    if isinstance(mxu_dtype, str) and mxu_dtype == "auto":
        # bf16 operands (f32 accumulation) once the gram matmul is compute-bound.
        # Critical on v5e's bf16-native MXU, beneficial on v6e/v7x for large C.
        return jnp.bfloat16 if c >= 512 else None
    return mxu_dtype


def _pick_hw_tile(hwp, max_tile):
    """Largest multiple-of-128 divisor of hwp that is <= max_tile (hwp % 128 == 0)."""
    if hwp <= max_tile:
        return hwp
    best = 128
    t = 256
    while t <= max_tile:
        if hwp % t == 0:
            best = t
        t += 128
    return best


def _pick_batch_tile(b, per_b_bytes, budget_bytes):
    """Batch elements per grid step, sized from the real VMEM budget."""
    bt = int(max(1, min(b, budget_bytes // max(per_b_bytes, 1))))
    if b >= 2:
        # Keep >= 2 grid steps on the parallel batch axis so both v7x
        # TensorCores (megacore) get work; also amortizes per-step overhead.
        bt = min(bt, max(1, b // 2))
    while b % bt:
        bt -= 1
    return bt


# --------------------------------------------------------------------------- #
# Wrapper
# --------------------------------------------------------------------------- #
def channel_attention(x, beta, *, mxu_dtype="auto", hw_tile_max=4096,
                      force_two_pass=False, deep_buffering=False):
    """x: (B, C, H, W); beta: scalar parameter (PyTorch init: 0.0)."""
    B, C, H, W = x.shape
    HW = H * W
    HWp = -(-HW // 128) * 128          # pad HW up to a lane-aligned multiple of 128
    x_flat = x.reshape(B, C, HW)
    if HWp != HW:
        # Zero columns contribute 0 to the gram; the padded projection tail is
        # sliced off below.
        x_flat = jnp.pad(x_flat, ((0, 0), (0, 0), (0, HWp - HW)))

    itemsize = x_flat.dtype.itemsize
    mxu_dt = _resolve_mxu_dtype(mxu_dtype, C)
    beta_arr = jnp.asarray(beta, dtype=jnp.float32).reshape(1)

    cap = _physical_vmem_bytes()
    budget = max(cap - (16 << 20), 24 << 20)          # headroom for Mosaic scratch
    vmem_limit = int(max(cap - (4 << 20), 32 << 20))  # compile-time scoped limit

    att_bytes = C * C * 4
    # Per-batch-element footprint of the fused kernel: double-buffered in + out
    # slabs, an f32 feat temporary, and gram/exp/att temporaries.
    fused_per_b = 4 * C * HWp * itemsize + C * HWp * 4 + 4 * att_bytes

    if (not force_two_pass) and fused_per_b + (4 << 20) <= budget:
        # ----------------- fused single-pass path (x read once) ------------- #
        Bt = _pick_batch_tile(B, fused_per_b, budget - (4 << 20))
        n_b = B // Bt
        out_flat = pl.pallas_call(
            functools.partial(_fused_kernel, mxu_dtype=mxu_dt),
            out_shape=jax.ShapeDtypeStruct((B, C, HWp), x.dtype),
            grid_spec=pltpu.PrefetchScalarGridSpec(
                num_scalar_prefetch=0,
                grid=(n_b,),
                in_specs=[
                    pl.BlockSpec(memory_space=pltpu.MemorySpace.SMEM),   # beta
                    pl.BlockSpec((Bt, C, HWp), lambda b: (b, 0, 0)),     # x slab
                ],
                out_specs=pl.BlockSpec((Bt, C, HWp), lambda b: (b, 0, 0)),
            ),
            compiler_params=pltpu.CompilerParams(
                dimension_semantics=("parallel",),
                vmem_limit_bytes=vmem_limit,
            ),
        )(beta_arr, x_flat)
    else:
        # -------------- two-pass streamed path (large C*HW slabs) ----------- #
        n_buf = 3 if deep_buffering else 2
        x_budget = max(budget // 2, 8 << 20)
        t_cap = min(hw_tile_max, max(128, x_budget // (2 * n_buf * C * itemsize)))
        T = _pick_hw_tile(HWp, t_cap)
        n_t = HWp // T
        per_b = 2 * n_buf * C * T * itemsize + 2 * att_bytes + C * T * 4
        Bt = _pick_batch_tile(B, per_b, budget)
        n_b = B // Bt

        if deep_buffering:
            x_spec = pl.BlockSpec((Bt, C, T), lambda b, t: (b, 0, t),
                                  pipeline_mode=pl.Buffered(3))
        else:
            x_spec = pl.BlockSpec((Bt, C, T), lambda b, t: (b, 0, t))

        # Pass 1: attention = softmax(rowmax(gram) - gram), gram accumulated over
        # HW tiles directly into the resident (Bt, C, C) output block.
        att = pl.pallas_call(
            functools.partial(_attention_kernel, mxu_dtype=mxu_dt),
            out_shape=jax.ShapeDtypeStruct((B, C, C), jnp.float32),
            grid_spec=pltpu.PrefetchScalarGridSpec(
                num_scalar_prefetch=0,
                grid=(n_b, n_t),
                in_specs=[x_spec],
                out_specs=pl.BlockSpec((Bt, C, C), lambda b, t: (b, 0, 0)),
            ),
            compiler_params=pltpu.CompilerParams(
                dimension_semantics=("parallel", "arbitrary"),
                vmem_limit_bytes=vmem_limit,
            ),
        )(x_flat)

        # Pass 2: out = beta * (att @ x) + x, streamed over HW tiles.
        out_flat = pl.pallas_call(
            functools.partial(_project_kernel, mxu_dtype=mxu_dt),
            out_shape=jax.ShapeDtypeStruct((B, C, HWp), x.dtype),
            grid_spec=pltpu.PrefetchScalarGridSpec(
                num_scalar_prefetch=0,
                grid=(n_b, n_t),
                in_specs=[
                    pl.BlockSpec(memory_space=pltpu.MemorySpace.SMEM),   # beta
                    pl.BlockSpec((Bt, C, C), lambda b, t: (b, 0, 0)),    # attention
                    x_spec,                                              # x tile
                ],
                out_specs=pl.BlockSpec((Bt, C, T), lambda b, t: (b, 0, t)),
            ),
            compiler_params=pltpu.CompilerParams(
                dimension_semantics=("parallel", "parallel"),
                vmem_limit_bytes=vmem_limit,
            ),
        )(beta_arr, att, x_flat)

    if HWp != HW:
        out_flat = out_flat[:, :, :HW]
    return out_flat.reshape(B, C, H, W)


# --------------------------------------------------------------------------- #
# Reference + test
# --------------------------------------------------------------------------- #
def _reference(x, beta):
    B, C, H, W = x.shape
    a = x.reshape(B, C, H * W)
    att = jnp.einsum("bcd,bed->bce", a, a)
    att_new = jnp.max(att, axis=-1, keepdims=True) - att
    att = jax.nn.softmax(att_new, axis=-1)
    feat_e = jnp.einsum("bce,bed->bcd", att, a).reshape(B, C, H, W)
    return beta * feat_e + x


if __name__ == "__main__":
    key = jax.random.PRNGKey(0)
    B, C, H, W = 2, 4, 16, 16
    x = jax.random.normal(key, (B, C, H, W), dtype=jnp.float32)

    # Parameter: beta initialized to zero as in nn.Parameter(torch.zeros(1));
    # also test a nonzero value to exercise the attention path.
    beta_init = jnp.float32(0.0)
    beta_test = jnp.float32(0.5)

    out0 = jax.block_until_ready(channel_attention(x, beta_init))
    out1 = jax.block_until_ready(channel_attention(x, beta_test))
    # Exercise the two-pass streamed path with HW-tiled gram accumulation.
    out1_stream = jax.block_until_ready(
        channel_attention(x, beta_test, force_two_pass=True, hw_tile_max=128))

    ref0 = _reference(x, beta_init)
    ref1 = _reference(x, beta_test)

    assert jnp.allclose(out0, ref0, atol=1e-5, rtol=1e-5)
    assert jnp.allclose(out1, ref1, atol=1e-4, rtol=1e-4)
    assert jnp.allclose(out1_stream, ref1, atol=1e-4, rtol=1e-4)

    # Non-multiple-of-128 H*W exercises the zero-padding path.
    x2 = jax.random.normal(jax.random.PRNGKey(1), (2, 4, 9, 9), dtype=jnp.float32)
    out2 = jax.block_until_ready(channel_attention(x2, beta_test))
    ref2 = _reference(x2, beta_test)
    assert jnp.allclose(out2, ref2, atol=1e-4, rtol=1e-4)

    print("KERNEL_OK")
</pallas_src>

<mosaic_0001>
module attributes {stable_mosaic.version = 11 : i64} {
  func.func @_fused_kernel(%arg0: i32, %arg1: memref<1xf32, #tpu.memory_space<smem>>, %arg2: memref<1x4x256xf32, #tpu.memory_space<vmem>>, %arg3: memref<1x4x256xf32, #tpu.memory_space<vmem>>) attributes {dimension_semantics = [#tpu.dimension_semantics<parallel>], iteration_bounds = array<i64: 2>, scalar_prefetch = 0 : i64, scratch_operands = 0 : i64, tpu.core_type = #tpu.core_type<tc>, window_params = [{transform_indices = @transform_0, window_bounds = array<i64: 1>}, {transform_indices = @transform_1, window_bounds = array<i64: 1, 4, 256>}, {transform_indices = @transform_2, window_bounds = array<i64: 1, 4, 256>}]} {
    %c0 = arith.constant 0 : index
    %c0_0 = arith.constant 0 : index
    %c0_1 = arith.constant 0 : index
    %0 = vector.load %arg2[%c0, %c0_0, %c0_1] : memref<1x4x256xf32, #tpu.memory_space<vmem>>, vector<1x4x256xf32>
    %cst = arith.constant dense<0.000000e+00> : vector<1x4x4xf32>
    %1 = tpu.matmul %0, %0, %cst {dimension_numbers = #tpu.dot_dimension_numbers<[2], [2], [1], [1], [0, 0, 0, 1, 1, 1], [0], [0]>} : vector<1x4x256xf32>, vector<1x4x256xf32>, vector<1x4x4xf32> -> vector<1x4x4xf32>
    %cst_2 = arith.constant dense<0x7F800000> : vector<1x4xf32>
    %2 = vector.multi_reduction <minimumf>, %1, %cst_2 [2] : vector<1x4x4xf32> to vector<1x4xf32>
    %3 = vector.shape_cast %2 : vector<1x4xf32> to vector<1x4x1xf32>
    %4 = vector.broadcast %3 : vector<1x4x1xf32> to vector<1x4x4xf32>
    %5 = arith.subf %4, %1 : vector<1x4x4xf32>
    %6 = math.exp %5 : vector<1x4x4xf32>
    %cst_3 = arith.constant dense<0.000000e+00> : vector<1x4xf32>
    %7 = vector.multi_reduction <add>, %6, %cst_3 [2] : vector<1x4x4xf32> to vector<1x4xf32>
    %8 = vector.shape_cast %7 : vector<1x4xf32> to vector<1x4x1xf32>
    %9 = vector.broadcast %8 : vector<1x4x1xf32> to vector<1x4x4xf32>
    %10 = arith.divf %6, %9 : vector<1x4x4xf32>
    %cst_4 = arith.constant dense<0.000000e+00> : vector<1x4x256xf32>
    %11 = tpu.matmul %10, %0, %cst_4 {dimension_numbers = #tpu.dot_dimension_numbers<[2], [1], [1], [2], [0, 0, 0, 1, 1, 2], [0], [0]>} : vector<1x4x4xf32>, vector<1x4x256xf32>, vector<1x4x256xf32> -> vector<1x4x256xf32>
    %c0_5 = arith.constant 0 : index
    %12 = memref.load %arg1[%c0_5] : memref<1xf32, #tpu.memory_space<smem>>
    %13 = vector.broadcast %12 : f32 to vector<1x4x256xf32>
    %14 = arith.mulf %13, %11 : vector<1x4x256xf32>
    %15 = arith.addf %14, %0 : vector<1x4x256xf32>
    %c0_6 = arith.constant 0 : index
    %c0_7 = arith.constant 0 : index
    %c0_8 = arith.constant 0 : index
    %16 = vector.load %arg3[%c0_6, %c0_7, %c0_8] : memref<1x4x256xf32, #tpu.memory_space<vmem>>, vector<1x4x256xf32>
    tpu.vector_store %arg3[%c0_6, %c0_7, %c0_8], %15 {strides = array<i32>} : memref<1x4x256xf32, #tpu.memory_space<vmem>>, vector<1x4x256xf32>,
    return
  }
  func.func @transform_0(%arg0: i32) -> i32 {
    %c0_i32 = arith.constant 0 : i32
    %c0_i32_0 = arith.constant 0 : i32
    return %c0_i32 : i32
  }
  func.func @transform_1(%arg0: i32) -> (i32, i32, i32) {
    %c0_i32 = arith.constant 0 : i32
    %c0_i32_0 = arith.constant 0 : i32
    %c0_i32_1 = arith.constant 0 : i32
    return %arg0, %c0_i32, %c0_i32_0 : i32, i32, i32
  }
  func.func @transform_2(%arg0: i32) -> (i32, i32, i32) {
    %c0_i32 = arith.constant 0 : i32
    %c0_i32_0 = arith.constant 0 : i32
    %c0_i32_1 = arith.constant 0 : i32
    return %arg0, %c0_i32, %c0_i32_0 : i32, i32, i32
  }
}

</mosaic_0001>

<bundles_post_ra>
// kernel: tpu_custom_call.1
= control target key start
LH: loop header
LB: loop body
LE: loop exit
PB: predicated region body
PF: predicated region fallthrough
CT: control target
= control target key end

     0   :  { %s754_s0 = inlined_call_operand.<no memory space> [shape: f32[1], index: 0, kind: input, shape index: {}]   ;;  %s755_s1 = inlined_call_operand.hbm [shape: f32[2,4,256], index: 1, kind: input, shape index: {}]   ;;  %s756_s2 = inlined_call_operand.hbm [shape: f32[2,4,256], index: 2, kind: output, shape index: {}]  }
   0x1   :  { %7 = sst [smem:[#allocation2]] %s754_s0 }
   0x2   :  { %8 = vsyncpa [#allocation4], 0 }
   0x3   :  { %10 = vsyncpa [#allocation4 + $0x1], 0 }
   0x4   :  { %11 = vsyncpa [#allocation5], 0 }
   0x5   :  { %13 = vsyncpa [#allocation5 + $0x1], 0  ;;  %s609_s11 = smov 0   ;;  %s611_s12 = smov 0  }
   0x6   :  { %s613_s13 = smov 0   ;;  %s615_s14 = smov 0  }
   0x7 LB: > { %s630_s0 = sadd.s32 4294967295, %s586_s14   ;;  %s423_s15 = sadd.s32 4294967294, %s586_s14   ;;  %s586_s14 = sphi %s615_s14, %s773_s14   ;;  %s582_s13 = sphi %s613_s13, %s772_s13   ;;  %s578_s12 = sphi %s611_s12, %s771_s12   ;;  %s574_s11 = sphi %s609_s11, %s770_s11  }
   0x8   : > { %s634_s16 = sadd.s32 1, %s586_s14   ;;  %s47_s17 = sadd.s32 1, %s582_s13 }
   0x9   : > { %s44_s18 = ssub.s32 %s586_s14, %s634_s16  ;;  %p54_p0 = scmp.ne.s32.totalorder %s582_s13, %s578_s12 }
   0xa   : > { %p45_p1 = scmp.eq.s32.totalorder %s44_s18, 0  ;;  %p55_p2 = scmp.eq.s32.totalorder %s586_s14, 0 }
   0xb   : > { %p60_p3 = scmp.ne.s32.totalorder %s578_s12, %s574_s11  ;;  %p61_p4 = scmp.eq.s32.totalorder %s630_s0, 0 }
   0xc   : > { %s646_s19 = scalar_select %p45_p1, %s582_s13, %s47_s17  }
   0xd   : > { %p648_p5 = por %p55_p2, %p54_p0  ;;  %p652_p6 = por %p61_p4, %p60_p3 }
   0xe   : > { %p84_p7 = scmp.eq.s32.totalorder %s630_s0, 1  ;;  %p90_p8 = scmp.eq.s32.totalorder %s423_s15, 1 }
   0xf   : > { %s760_s21 = scalar_select %p652_p6, 1, 0 }
  0x10   : > { %p454_p10 = scmp.lt.s32.totalorder %s586_s14, 2  ;;  %p659_p11 = por %p84_p7, %p54_p0 }
  0x11   : > { %p663_p12 = por %p90_p8, %p60_p3  ;;  %s113_s24 = sand.u32 1, %s582_s13  }
  0x12   : > { %s761_s22 = scalar_select %p659_p11, 1, 0 }
  0x13   : > { %s762_s23 = scalar_select %p663_p12, 1, 0 }
  0x14   : > { %s440_s25 = sshll.u32 %s586_s14, 7  ;;  %s426_s26 = sshll.u32 %s113_s24, 3 }
  0x15   : > { %s672_s29 = scalar_lea.hbm %s755_s1, %s440_s25  ;;  %s117_s30 = scalar_lea.vmem [#allocation3], %s426_s26 }
  0x16   : > { %s125_s3 = sshll.u32 %s117_s30, 4  ;;  %p676_p13 = pnand %p454_p10, %p648_p5  ;;  %s680_s3 = int_to_ptr.vmem [resolvable:$true] %s125_s3 }
  0x17   : > { %s114_s5 = scalar_lea.sflag [#allocation4], %s113_s24  ;;  %s494_s6 = scalar_lea.hbm %s672_s29, 128 }
  0x18   : > { %p495_p2 = scmp.ne.s32.totalorder %s672_s29, %s494_s6  ;;  %p496_p3 = pneg %p676_p13 }
  0x19   : > { %s499_s9 = scalar_lea.hbm %s755_s1, 256  ;;  %p500_p5 = scmp.lt.s32.totalorder %s672_s29, %s755_s1 }
  0x1a   : > { %p497_p4 = pnand %p496_p3, %p495_p2  ;;  %p501_p8 = scmp.lt.s32.totalorder %s499_s9, %s494_s6 }
  0x1c   : > { %p498_p7 = pneg %p497_p4  ;;  %p502_p10 = por %p501_p8, %p500_p5 }
  0x1e   : > { %p503_p9 = pnand %p502_p10, %p498_p7 }
  0x20   : > { %506 = shalt.err (!%p503_p9)
}
  0x21   : > { %s507_s17 = scalar_lea.vmem %s680_s3, 128  ;;  %s588_s18 = smov [#allocation3]  }
  0x22   : > { %p508_p0 = scmp.ne.s32.totalorder %s680_s3, %s507_s17  ;;  %s512_s20 = sshll.u32 %s588_s18, 4  ;;  %s513_s20 = int_to_ptr.vmem [resolvable:$false] %s512_s20 }
  0x23   : > { %s514_s24 = scalar_lea.vmem %s513_s20, 256  ;;  %p515_p4 = scmp.lt.s32.totalorder %s680_s3, %s513_s20 }
  0x24   : > { %p510_p1 = pnand %p508_p0, %p496_p3  ;;  %p516_p12 = scmp.lt.s32.totalorder %s514_s24, %s507_s17 }
  0x26   : > { %p511_p2 = pneg %p510_p1  ;;  %p517_p11 = por %p516_p12, %p515_p4 }
  0x28   : > { %p518_p6 = pnand %p517_p11, %p511_p2 }
  0x2a   : > { %521 = shalt.err (!%p518_p6)
}
  0x2b   : > { %449 = dma.hbm_to_vmem [thread:$0]  (!%p676_p13), %s672_s29, 128, %s680_s3, %s114_s5  }
  0x2c   : > { %p764_p9 = scmp.lt.s32.totalorder %s586_s14, 3  ;;  %p765_p7 = scmp.ge.s32.totalorder %s586_s14, 1 }
  0x2e   : > { %p131_p0 = pnand %p765_p7, %p764_p9 }
  0x2f   : > { %s707_s25 = sand.u32 (!%p131_p0), 1, %s578_s12   ;;  %p766_p6 = scmp.ne.s32.totalorder (!%p131_p0), %s760_s21, 0 }
  0x30   : > { %134 = sbr.rel (%p131_p0) target bundleno = 780 (0x30c), region = 28  ;;  %s430_s26 = sshll.u32 (!%p131_p0), %s707_s25, 3 }
  0x31   : > { %s137_s27 = scalar_lea.sflag (!%p131_p0), [#allocation4], %s707_s25  ;;  %s140_s28 = scalar_lea.vmem (!%p131_p0), [#allocation3], %s430_s26 }
  0x35   : > { %565 = dma.done.wait (%p766_p6), %s137_s27, 128  }
  0x36   : > { %567 = vsyncadd (%p766_p6), %s137_s27, 4294967168  ;;  %v161_v0 = vld [vmem:[%s140_s28] sm:$0xff]  ;;  %vm235_vm0 = vcmask 27648   ;;  %vm251_vm1 = vcmask 1043456   ;;  %v589_v10 = vmov 0.0   ;;  %vm247_vm2 = vcmask 31744  }
  0x37   : > { %v163_v1 = vcombine.high %v161_v0, %v161_v0  ;;  %320 = vmatprep.mubr.f32.mxu1 %v589_v10  ;;  %s327_s21 = sld [smem:[#allocation2]]  ;;  %s441_s29 = sshll.u32 %s630_s0, 7 }
  0x38   : > { %s160_s30 = scalar_lea.vmem [#allocation6], %s430_s26  ;;  %s351_s6 = scalar_lea.hbm %s756_s2, %s441_s29 }
  0x39   : > { %195 = vmatprep.subr.mxu0 %v163_v1  ;;  %229 = vmatprep.mubr.f32.mxu0 %v163_v1  ;;  %s353_s3 = sshll.u32 %s160_s30, 4  ;;  %s339_s7 = scalar_lea.sflag [#allocation5], %s707_s25  ;;  %s354_s3 = int_to_ptr.vmem [resolvable:$true] %s353_s3 }
  0x3a   : > { %196 = vmatpush1.xpose.msra.mxu0 %v161_v0  ;;  %432 = vmatprep.subr.msk.mxu1 %vm251_vm1, %v163_v1  ;;  %s522_s8 = scalar_lea.vmem %s354_s3, 128  ;;  %p767_p12 = scmp.ne.s32.totalorder %s761_s22, 0 }
  0x3b   : > { %433 = vmatpush1.msk.msra.mxu1 %vm251_vm1, %v161_v0  ;;  %p523_p11 = scmp.ne.s32.totalorder %s354_s3, %s522_s8  ;;  %s590_s9 = smov [#allocation6]  }
  0x3c   : > { %s526_s0 = sshll.u32 %s590_s9, 4  ;;  %s527_s0 = int_to_ptr.vmem [resolvable:$false] %s526_s0 }
  0x3d   : > { %230 = vmatmul.mubr.f32.vlgmr.msra.gmra.mxu0 %v161_v0  ;;  %v328_v14 = vstv %s327_s21  ;;  %p524_p13 = pnand %p523_p11, %p767_p12  ;;  %s528_s10 = scalar_lea.vmem %s527_s0, 256 }
  0x3e   : > { %p529_p3 = scmp.lt.s32.totalorder %s354_s3, %s527_s0  ;;  %p530_p5 = scmp.lt.s32.totalorder %s528_s10, %s522_s8 }
  0x3f   : > { %p525_p1 = pneg %p524_p13 }
  0x40   : > { %p531_p8 = por %p530_p5, %p529_p3 }
  0x42   : > { %p532_p10 = pnand %p531_p8, %p525_p1 }
  0xfd   : > { %v231_v2 = vpop.f32.mrf.mxu0 }
  0xfe   : > { %v236_v3 = vsel %vm235_vm0, %v231_v2, inf }
  0xff   : > { %237 = vmin.xlane.f32.xlu0 %v236_v3  ;;  %v233_v4 = vpop.f32.mrf.mxu0 }
 0x188   : > { %v238_v5 = vpop.xlane.xlu0 %237 }
 0x189   : > { %v239_v6 = vsub.f32 %v238_v5, %v231_v2 }
 0x18b   : > { %v240_v7 = vmul.f32 1.442695, %v239_v6 }
 0x18d   : > { %490 = vpow2.f32 %v240_v7 }
 0x19a   : > { %v491_v8 = vpop.eup %490 }
 0x19b   : > { %v242_v9 = vsel %vm235_vm0, %v491_v8, 0.0 }
 0x19c   : > { %243 = vadd.xlane.f32.xlu0 %v242_v9 }
 0x225   : > { %v244_v11 = vpop.xlane.xlu0 %243 }
 0x226   : > { %492 = vrcp.f32 %v244_v11 }
 0x233   : > { %v493_v12 = vpop.eup %492 }
 0x234   : > { %v246_v13 = vmul.f32 %v493_v12, %v491_v8 }
 0x236   : > { %434 = vmatmul.mubr.msk.f32.vlgmr.msra.gmra.mxu1 %vm247_vm2, %v246_v13 }
 0x2f6   : > { %v322_v15 = vpop.f32.mrf.mxu1 }
 0x2f7   : > { %v329_v16 = vmul.f32 %v328_v14, %v322_v15 }
 0x2f8   : > { %v324_v17 = vpop.f32.mrf.mxu1 }
 0x2f9   : > { %v330_v18 = vmul.f32 %v328_v14, %v324_v17  ;;  %v331_v19 = vadd.f32 %v329_v16, %v161_v0 }
 0x2fb   : > { %v332_v20 = vadd.f32 %v330_v18, %v163_v1 }
 0x2fd   : > { %v335_v21 = vcombine.low %v331_v19, %v332_v20 }
 0x2ff   : > { %337 = vst [vmem:[%s160_s30] sm:$0xff] %v335_v21 }
 0x300   : > { %535 = shalt.err (!%p532_p10)
}
 0x301   : > { %s536_s15 = scalar_lea.hbm %s351_s6, 128  ;;  %s540_s20 = scalar_lea.hbm %s756_s2, 256 }
 0x302   : > { %p537_p2 = scmp.ne.s32.totalorder %s351_s6, %s536_s15  ;;  %p541_p7 = scmp.lt.s32.totalorder %s351_s6, %s756_s2 }
 0x303   : > { %p542_p0 = scmp.lt.s32.totalorder %s540_s20, %s536_s15 }
 0x304   : > { %p538_p4 = pnand %p537_p2, %p767_p12 }
 0x305   : > { %p543_p6 = por %p542_p0, %p541_p7 }
 0x306   : > { %p539_p9 = pneg %p538_p4 }
 0x308   : > { %p544_p11 = pnand %p543_p6, %p539_p9 }
 0x30a   : > { %547 = shalt.err (!%p544_p11)
}
 0x30b   : > { %444 = dma.vmem_to_hbm [thread:$0]  (%p767_p12), %s354_s3, 128, %s351_s6, %s339_s7  }
 0x30c PF: > { %s365_s26 = sand.u32 1, %s574_s11   ;;  %p768_p13 = scmp.ne.s32.totalorder %s762_s23, 0 }
 0x30d   : > { %p769_p1 = scmp.ge.s32.totalorder %s586_s14, 2  ;;  %s366_s27 = scalar_lea.sflag [#allocation5], %s365_s26 }
 0x30f   : > { %p451_p3 = pnand %p769_p1, %p768_p13 }
 0x311   : > { %p452_p5 = pneg %p451_p3 }
 0x313   : > { %569 = dma.done.wait (%p452_p5), %s366_s27, 128  }
 0x314   : > { %571 = vsyncadd (%p452_p5), %s366_s27, 4294967168  ;;  %p16_p8 = scmp.ge.s32.totalorder %s634_s16, 4   ;;  %s770_s11 = smov %s578_s12 }
 0x315   : > { %s771_s12 = smov %s582_s13  ;;  %s772_s13 = smov %s646_s19 }
 0x316   : > { %s773_s14 = smov %s634_s16  ;;  %18 = sbr.rel (!%p16_p8) target bundleno = 7 (0x7), region = 73 }
 0x31b   :  { %371 = vsyncpa [#allocation4], 1 }
 0x31c   :  { %373 = vsyncpa [#allocation4 + $0x1], 1 }
 0x31d   :  { %374 = vsyncpa [#allocation5], 1 }
 0x31e   :  { %376 = vsyncpa [#allocation5 + $0x1], 1 }

</bundles_post_ra>
